<compile_context>
chip_gen: v7x
topology: tpu7x:2x2x1
jax: 0.10.0
libtpu: 0.0.40
codegen_flags: <defaults>
</compile_context>

<pallas_src>
import math

import jax
import jax.numpy as jnp
from jax.experimental import pallas as pl
from jax.experimental.pallas import tpu as pltpu

MAX_STEP = 128
D_IN = int(MAX_STEP / 4)      # 32
D_H1 = int(MAX_STEP / 2)      # 64
D_H2 = int(MAX_STEP / 1.5)    # 85
D_H2_PAD = 128                # lane-aligned hidden width
D_OUT = MAX_STEP              # 128


def vae2_decode_kernel(x_ref, w56_ref, b56_ref, w78_ref, b78_ref, o_ref):
    x = x_ref[...]
    # fused fc5+fc6, sigmoid on EUP
    h = jax.nn.sigmoid(
        jnp.dot(x, w56_ref[...], preferred_element_type=jnp.float32)
        + b56_ref[...])
    # fused fc7+fc8
    out = (jnp.dot(h, w78_ref[...], preferred_element_type=jnp.float32)
           + b78_ref[...])
    o_ref[...] = out.astype(o_ref.dtype)


def vae2_forward(x, folded, *, tm=256):
    """x: (B, D_IN) f32.  folded: dict from fold_and_pad_params."""
    B = x.shape[0]
    operands = (x, folded["w56"], folded["b56"], folded["w78"], folded["b78"])

    if B <= tm:
        # Small-batch path: no grid, everything fully resident in VMEM.
        vmem = pl.BlockSpec(memory_space=pltpu.MemorySpace.VMEM)
        return pl.pallas_call(
            vae2_decode_kernel,
            out_shape=jax.ShapeDtypeStruct((B, D_OUT), jnp.float32),
            in_specs=[vmem] * len(operands),
            out_specs=vmem,
        )(*operands)

    # Batched path: tile the batch dim; weights stay resident across steps
    # (constant index_map). "parallel" lets megacore/v7x shard the tiles.
    def resident(arr):
        return pl.BlockSpec(arr.shape, lambda i: (0, 0))

    return pl.pallas_call(
        vae2_decode_kernel,
        out_shape=jax.ShapeDtypeStruct((B, D_OUT), jnp.float32),
        grid=(pl.cdiv(B, tm),),
        in_specs=[
            pl.BlockSpec((tm, D_IN), lambda i: (i, 0)),
            resident(folded["w56"]), resident(folded["b56"]),
            resident(folded["w78"]), resident(folded["b78"]),
        ],
        out_specs=pl.BlockSpec((tm, D_OUT), lambda i: (i, 0)),
        compiler_params=pltpu.CompilerParams(
            dimension_semantics=("parallel",)),
    )(*operands)


def init_params(key):
    """nn.Linear-style init U(-1/sqrt(fan_in), 1/sqrt(fan_in)).

    Weights stored as (fan_in, fan_out) so math is x @ W (PyTorch stores
    (out, in) and does x @ W.T -- identical)."""
    dims = [(D_IN, D_H1), (D_H1, D_H2), (D_H2, D_OUT), (D_OUT, D_OUT)]
    names = ["5", "6", "7", "8"]
    params = {}
    keys = jax.random.split(key, 2 * len(dims))
    for i, ((fin, fout), n) in enumerate(zip(dims, names)):
        bound = 1.0 / math.sqrt(fin)
        params[f"w{n}"] = jax.random.uniform(
            keys[2 * i], (fin, fout), jnp.float32, -bound, bound)
        params[f"b{n}"] = jax.random.uniform(
            keys[2 * i + 1], (1, fout), jnp.float32, -bound, bound)
    return params


def fold_and_pad_params(params):
    """Fold the activation-free linear pairs and pad D_H2=85 -> 128."""
    w56 = params["w5"] @ params["w6"]                 # (D_IN, D_H2)
    b56 = params["b5"] @ params["w6"] + params["b6"]  # (1, D_H2)
    w78 = params["w7"] @ params["w8"]                 # (D_H2, D_OUT)
    b78 = params["b7"] @ params["w8"] + params["b8"]  # (1, D_OUT)

    pad = D_H2_PAD - D_H2
    w56p = jnp.pad(w56, ((0, 0), (0, pad)))
    b56p = jnp.pad(b56, ((0, 0), (0, pad)))
    # Zero rows in w78p kill the contribution of the padded hidden columns
    # (which come out of the sigmoid as 0.5), keeping the math exact.
    w78p = jnp.pad(w78, ((0, pad), (0, 0)))
    return {"w56": w56p, "b56": b56p, "w78": w78p, "b78": b78}


def vae2_reference(x, params):
    """Pure-JAX reference reproducing the original sequential PyTorch math."""
    h4 = x @ params["w5"] + params["b5"]
    h5 = jax.nn.sigmoid(h4 @ params["w6"] + params["b6"])
    h6 = h5 @ params["w7"] + params["b7"]
    return h6 @ params["w8"] + params["b8"]


if __name__ == "__main__":
    key = jax.random.PRNGKey(0)
    pkey, xkey = jax.random.split(key)

    params = init_params(pkey)
    folded = fold_and_pad_params(params)

    # --- small-batch path (no grid) ---
    B_small = 8
    x_small = jax.random.normal(xkey, (B_small, D_IN), dtype=jnp.float32)
    out_small = jax.block_until_ready(vae2_forward(x_small, folded))
    ref_small = vae2_reference(x_small, params)
    assert out_small.shape == (B_small, D_OUT)
    assert jnp.allclose(out_small, ref_small, atol=2e-4, rtol=2e-4)

    # --- batched path (grid over the batch, weights resident across steps) ---
    B_big = 512
    x_big = jax.random.normal(jax.random.PRNGKey(1), (B_big, D_IN),
                              dtype=jnp.float32)
    out_big = jax.block_until_ready(vae2_forward(x_big, folded, tm=256))
    ref_big = vae2_reference(x_big, params)
    assert out_big.shape == (B_big, D_OUT)
    assert jnp.allclose(out_big, ref_big, atol=2e-4, rtol=2e-4)

    print("KERNEL_OK")
</pallas_src>

<mosaic_0001>
module attributes {stable_mosaic.version = 11 : i64} {
  func.func @vae2_decode_kernel(%arg0: memref<8x32xf32, #tpu.memory_space<vmem>>, %arg1: memref<32x128xf32, #tpu.memory_space<vmem>>, %arg2: memref<1x128xf32, #tpu.memory_space<vmem>>, %arg3: memref<128x128xf32, #tpu.memory_space<vmem>>, %arg4: memref<1x128xf32, #tpu.memory_space<vmem>>, %arg5: memref<8x128xf32, #tpu.memory_space<vmem>>) attributes {dimension_semantics = [], scalar_prefetch = 0 : i64, scratch_operands = 0 : i64, tpu.core_type = #tpu.core_type<tc>} {
    %c0 = arith.constant 0 : index
    %c0_0 = arith.constant 0 : index
    %0 = vector.load %arg0[%c0, %c0_0] : memref<8x32xf32, #tpu.memory_space<vmem>>, vector<8x32xf32>
    %c0_1 = arith.constant 0 : index
    %c0_2 = arith.constant 0 : index
    %1 = vector.load %arg1[%c0_1, %c0_2] : memref<32x128xf32, #tpu.memory_space<vmem>>, vector<32x128xf32>
    %cst = arith.constant dense<0.000000e+00> : vector<8x128xf32>
    %2 = tpu.matmul %0, %1, %cst {dimension_numbers = #tpu.dot_dimension_numbers<[1], [0], [0], [1], [0, 0, 1, 1], [], []>} : vector<8x32xf32>, vector<32x128xf32>, vector<8x128xf32> -> vector<8x128xf32>
    %c0_3 = arith.constant 0 : index
    %c0_4 = arith.constant 0 : index
    %3 = vector.load %arg2[%c0_3, %c0_4] : memref<1x128xf32, #tpu.memory_space<vmem>>, vector<1x128xf32>
    %4 = vector.broadcast %3 : vector<1x128xf32> to vector<8x128xf32>
    %5 = arith.addf %2, %4 : vector<8x128xf32>
    %6 = arith.negf %5 : vector<8x128xf32>
    %7 = math.exp %6 : vector<8x128xf32>
    %cst_5 = arith.constant 1.000000e+00 : f32
    %8 = vector.broadcast %cst_5 : f32 to vector<8x128xf32>
    %9 = arith.addf %8, %7 : vector<8x128xf32>
    %10 = arith.divf %8, %9 : vector<8x128xf32>
    %c0_6 = arith.constant 0 : index
    %c0_7 = arith.constant 0 : index
    %11 = vector.load %arg3[%c0_6, %c0_7] : memref<128x128xf32, #tpu.memory_space<vmem>>, vector<128x128xf32>
    %cst_8 = arith.constant dense<0.000000e+00> : vector<8x128xf32>
    %12 = tpu.matmul %10, %11, %cst_8 {dimension_numbers = #tpu.dot_dimension_numbers<[1], [0], [0], [1], [0, 0, 1, 1], [], []>} : vector<8x128xf32>, vector<128x128xf32>, vector<8x128xf32> -> vector<8x128xf32>
    %c0_9 = arith.constant 0 : index
    %c0_10 = arith.constant 0 : index
    %13 = vector.load %arg4[%c0_9, %c0_10] : memref<1x128xf32, #tpu.memory_space<vmem>>, vector<1x128xf32>
    %14 = vector.broadcast %13 : vector<1x128xf32> to vector<8x128xf32>
    %15 = arith.addf %12, %14 : vector<8x128xf32>
    %c0_11 = arith.constant 0 : index
    %c0_12 = arith.constant 0 : index
    %16 = vector.load %arg5[%c0_11, %c0_12] : memref<8x128xf32, #tpu.memory_space<vmem>>, vector<8x128xf32>
    tpu.vector_store %arg5[%c0_11, %c0_12], %15 {strides = array<i32>} : memref<8x128xf32, #tpu.memory_space<vmem>>, vector<8x128xf32>,
    return
  }
}

</mosaic_0001>

<bundles_post_ra>
// kernel: tpu_custom_call.1
= control target key start
LH: loop header
LB: loop body
LE: loop exit
PB: predicated region body
PF: predicated region fallthrough
CT: control target
= control target key end

     0   :  { %10 = vsyncpa [#allocation3], 0  ;;  %s570_s0 = inlined_call_operand.hbm [shape: f32[8,32], index: 0, kind: input, shape index: {}]   ;;  %s571_s1 = inlined_call_operand.hbm [shape: f32[32,128], index: 1, kind: input, shape index: {}]   ;;  %s572_s2 = inlined_call_operand.vmem [shape: f32[1,128], index: 2, kind: input, shape index: {}]   ;;  %s573_s3 = inlined_call_operand.hbm [shape: f32[128,128], index: 3, kind: input, shape index: {}]   ;;  %s574_s4 = inlined_call_operand.vmem [shape: f32[1,128], index: 4, kind: input, shape index: {}]   ;;  %s575_s5 = inlined_call_operand.hbm [shape: f32[8,128], index: 5, kind: output, shape index: {}]  }
   0x1   :  { %11 = vsyncpa [#allocation6], 0 }
   0x2   :  { %12 = vsyncpa [#allocation4], 0  ;;  %s471_s18 = smov [#allocation5]   ;;  %s377_s22 = scalar_lea.hbm %s571_s1, 512 }
   0x3   :  { %s28_s19 = sshll.u32 %s471_s18, 4  ;;  %p378_p0 = scmp.ne.s32.totalorder %s571_s1, %s377_s22  ;;  %s29_s19 = int_to_ptr.vmem [resolvable:$true] %s28_s19 }
   0x4   :  { %p381_p1 = scmp.lt.u32.totalorder %s377_s22, %s571_s1 }
   0x6   :  { %p383_p2 = pnand %p381_p1, %p378_p0 }
   0x8   :  { %386 = shalt.err (!%p383_p2)
}
   0x9   :  { %s387_s27 = scalar_lea.vmem %s29_s19, 512  ;;  %p392_p4 = scmp.lt.s32.totalorder %s29_s19, %s29_s19 }
   0xa   :  { %p388_p3 = scmp.ne.s32.totalorder %s29_s19, %s387_s27  ;;  %p393_p5 = scmp.lt.s32.totalorder %s387_s27, %s387_s27 }
   0xc   :  { %p394_p6 = por %p393_p5, %p392_p4 }
   0xe   :  { %p395_p7 = pnand %p394_p6, %p388_p3 }
  0x10   :  { %398 = shalt.err (!%p395_p7)
}
  0x11   :  { %s472_s28 = smov 128   ;;  %s473_s29 = smov 8  }
  0x12   :  { %34 = dma.hbm_to_vmem [thread:$0]  %s571_s1, 512, %s29_s19, [#allocation6], %s472_s28, %s472_s28, %s473_s29  }
  0x13   :  { %s474_s7 = smov [#allocation2]   ;;  %s475_s9 = smov [#allocation7]  }
  0x14   :  { %s19_s8 = sshll.u32 %s474_s7, 4  ;;  %s42_s10 = sshll.u32 %s475_s9, 4  ;;  %s20_s8 = int_to_ptr.vmem [resolvable:$true] %s19_s8  ;;  %s43_s10 = int_to_ptr.vmem [resolvable:$true] %s42_s10 }
  0x15   :  { %s399_s13 = scalar_lea.hbm %s570_s0, 128 }
  0x16   :  { %p400_p8 = scmp.ne.s32.totalorder %s570_s0, %s399_s13  ;;  %p403_p9 = scmp.lt.u32.totalorder %s399_s13, %s570_s0 }
  0x18   :  { %p405_p10 = pnand %p403_p9, %p400_p8 }
  0x1a   :  { %408 = shalt.err (!%p405_p10)
}
  0x1b   :  { %s409_s1 = scalar_lea.vmem %s20_s8, 128  ;;  %p414_p12 = scmp.lt.s32.totalorder %s20_s8, %s20_s8 }
  0x1c   :  { %p410_p11 = scmp.ne.s32.totalorder %s20_s8, %s409_s1  ;;  %p415_p13 = scmp.lt.s32.totalorder %s409_s1, %s409_s1 }
  0x1e   :  { %p416_p0 = por %p415_p13, %p414_p12 }
  0x20   :  { %p417_p1 = pnand %p416_p0, %p410_p11 }
  0x22   :  { %420 = shalt.err (!%p417_p1)
}
  0x23   :  { %22 = dma.hbm_to_vmem [thread:$0]  %s570_s0, 128, %s20_s8, [#allocation3]  }
  0x24   :  { %s421_s22 = scalar_lea.hbm %s573_s3, 2048 }
  0x25   :  { %p422_p2 = scmp.ne.s32.totalorder %s573_s3, %s421_s22  ;;  %p425_p3 = scmp.lt.u32.totalorder %s421_s22, %s573_s3 }
  0x27   :  { %p427_p4 = pnand %p425_p3, %p422_p2 }
  0x29   :  { %430 = shalt.err (!%p427_p4)
}
  0x2a   :  { %s431_s27 = scalar_lea.vmem %s43_s10, 2048  ;;  %p436_p6 = scmp.lt.s32.totalorder %s43_s10, %s43_s10 }
  0x2b   :  { %p432_p5 = scmp.ne.s32.totalorder %s43_s10, %s431_s27  ;;  %p437_p7 = scmp.lt.s32.totalorder %s431_s27, %s431_s27 }
  0x2d   :  { %p438_p8 = por %p437_p7, %p436_p6 }
  0x2f   :  { %p439_p9 = pnand %p438_p8, %p432_p5 }
  0x31   :  { %442 = shalt.err (!%p439_p9)
}
  0x32   :  { %48 = dma.hbm_to_vmem [thread:$0]  %s573_s3, 2048, %s43_s10, [#allocation6], %s472_s28, %s472_s28, %s473_s29  }
  0x33   :  { %465 = dma.done.wait [#allocation3], 128  }
  0x34   :  { %466 = vsyncadd [#allocation3], 4294967168 }
  0x35   :  { %467 = dma.done.wait [#allocation6], 2560  }
  0x36   :  { %468 = vsyncadd [#allocation6], 4294964736  ;;  %v476_v0 = vmov 0.0|0.0   ;;  %vm477_vm0 = vmmov 0   ;;  %v478_v1 = vmov 0.0   ;;  %v61_v2 = vld [vmem:[#allocation5] sm:$0xff] }
  0x37   :  { %334 = vmatprep.subr.bf16.mxu0 %v476_v0  ;;  %296 = vmatprep.mubr.msk.f32.mxu0 %vm477_vm0, %v478_v1  ;;  %v62_v3 = vld [vmem:[#allocation5 + $0x8] sm:$0xff]  ;;  %v63_v4 = vld [vmem:[#allocation5 + $0x10] sm:$0xff]  ;;  %v64_v6 = vld [vmem:[#allocation5 + $0x18] sm:$0xff]  ;;  %vm72_vm1 = vcmask 261120   ;;  %s479_s7 = smov [#allocation8]  }
  0x38   :  { %340 = vmatprep.subr.bf16.mxu1 %v476_v0  ;;  %331 = vmatprep.mubr.msk.f32.mxu1 %vm477_vm0, %v478_v1  ;;  %v335_v5 = vpack.c.bf16 %v62_v3, %v61_v2  ;;  %v152_v7 = vld [vmem:[#allocation7] sm:$0xff]  ;;  %v153_v8 = vld [vmem:[#allocation7 + $0x8] sm:$0xff]  ;;  %v338_v9 = vpack.c.bf16 %v64_v6, %v63_v4  ;;  %v60_v11 = vld [vmem:[#allocation2] sm:$0xff]  ;;  %s252_s8 = sshll.u32 %s479_s7, 4  ;;  %s253_s8 = int_to_ptr.vmem [resolvable:$true] %s252_s8 }
  0x39   :  { %v341_v10 = vpack.c.bf16 %v153_v8, %v152_v7  ;;  %v154_v12 = vld [vmem:[#allocation7 + $0x10] sm:$0xff]  ;;  %v155_v13 = vld [vmem:[#allocation7 + $0x18] sm:$0xff]  ;;  %v156_v15 = vld [vmem:[#allocation7 + $0x20] sm:$0xff]  ;;  %p448_p11 = scmp.lt.s32.totalorder %s253_s8, %s253_s8 }
  0x3a   :  { %336 = vmatpush3.bf16.msra.mxu0 %v335_v5  ;;  %v344_v14 = vpack.c.bf16 %v155_v13, %v154_v12  ;;  %v157_v16 = vld [vmem:[#allocation7 + $0x28] sm:$0xff]  ;;  %v158_v18 = vld [vmem:[#allocation7 + $0x30] sm:$0xff]  ;;  %v159_v19 = vld [vmem:[#allocation7 + $0x38] sm:$0xff] }
  0x3b   :  { %337 = vmatprep.subr.bf16.mxu0 %v476_v0  ;;  %342 = vmatpush3.bf16.msra.mxu1 %v341_v10  ;;  %v347_v17 = vpack.c.bf16 %v157_v16, %v156_v15  ;;  %v350_v20 = vpack.c.bf16 %v159_v19, %v158_v18  ;;  %v160_v21 = vld [vmem:[#allocation7 + $0x40] sm:$0xff]  ;;  %v161_v22 = vld [vmem:[#allocation7 + $0x48] sm:$0xff]  ;;  %v162_v24 = vld [vmem:[#allocation7 + $0x50] sm:$0xff] }
  0x3c   :  { %343 = vmatprep.subr.bf16.mxu1 %v476_v0  ;;  %v353_v23 = vpack.c.bf16 %v161_v22, %v160_v21  ;;  %v163_v25 = vld [vmem:[#allocation7 + $0x58] sm:$0xff]  ;;  %v164_v27 = vld [vmem:[#allocation7 + $0x60] sm:$0xff]  ;;  %v165_v28 = vld [vmem:[#allocation7 + $0x68] sm:$0xff] }
  0x3d   :  { %v356_v26 = vpack.c.bf16 %v163_v25, %v162_v24  ;;  %v359_v29 = vpack.c.bf16 %v165_v28, %v164_v27  ;;  %v166_v30 = vld [vmem:[#allocation7 + $0x70] sm:$0xff]  ;;  %v167_v31 = vld [vmem:[#allocation7 + $0x78] sm:$0xff] }
  0x3e   :  { %339 = vmatpush3.bf16.msra.mxu0 %v338_v9  ;;  %v362_v32 = vpack.c.bf16 %v167_v31, %v166_v30  ;;  %v262_v33 = vld [vmem:[%s572_s2] ss:$0 sm:$0xff]  ;;  %s443_s2 = scalar_lea.vmem %s253_s8, 128 }
  0x3f   :  { %345 = vmatpush3.bf16.msra.mxu1 %v344_v14  ;;  %v265_v41 = vld [vmem:[%s574_s4] ss:$0 sm:$0xff]  ;;  %p444_p10 = scmp.ne.s32.totalorder %s253_s8, %s443_s2  ;;  %p449_p12 = scmp.lt.s32.totalorder %s443_s2, %s443_s2 }
  0x40   :  { %346 = vmatprep.subr.bf16.mxu1 %v476_v0 }
  0x41   :  { %297 = vmatmul.mubr.msk.f32.vlgmr.msra.gmra.mrb[0].mxu0 %vm72_vm1, %v60_v11  ;;  %p450_p13 = por %p449_p12, %p448_p11 }
  0x43   :  { %348 = vmatpush3.bf16.msra.mxu1 %v347_v17  ;;  %p451_p0 = pnand %p450_p13, %p444_p10 }
  0x44   :  { %349 = vmatprep.subr.bf16.mxu1 %v476_v0 }
  0x47   :  { %351 = vmatpush3.bf16.msra.mxu1 %v350_v20 }
  0x48   :  { %352 = vmatprep.subr.bf16.mxu1 %v476_v0 }
  0x4b   :  { %354 = vmatpush3.bf16.msra.mxu1 %v353_v23 }
  0x4c   :  { %355 = vmatprep.subr.bf16.mxu1 %v476_v0 }
  0x4f   :  { %357 = vmatpush3.bf16.msra.mxu1 %v356_v26 }
  0x50   :  { %358 = vmatprep.subr.bf16.mxu1 %v476_v0 }
  0x53   :  { %360 = vmatpush3.bf16.msra.mxu1 %v359_v29 }
  0x54   :  { %361 = vmatprep.subr.bf16.mxu1 %v476_v0 }
  0x57   :  { %363 = vmatpush3.bf16.msra.mxu1 %v362_v32 }
 0x114   :  { %v142_v34 = vpop.f32.mrb[0].mxu0 }
 0x115   :  { %v143_v35 = vadd.f32 %v262_v33, %v142_v34  ;;  %v298_v36 = vpop.f32.mrb[1].mxu0 }
 0x117   :  { %v264_v37 = vmul.f32 -1.442695, %v143_v35 }
 0x119   :  { %373 = vpow2.f32 %v264_v37 }
 0x123   :  { %v374_v38 = vpop.eup %373 }
 0x124   :  { %v149_v39 = vadd.f32 1.0, %v374_v38 }
 0x126   :  { %375 = vrcp.f32 %v149_v39 }
 0x130   :  { %v376_v40 = vpop.eup %375 }
 0x131   :  { %332 = vmatmul.mubr.f32.vlgmr.msra.gmra.mrb[0].mxu1 %v376_v40 }
 0x204   :  { %v241_v42 = vpop.f32.mrb[0].mxu1 }
 0x205   :  { %v242_v43 = vadd.f32 %v265_v41, %v241_v42  ;;  %v333_v44 = vpop.f32.mrb[1].mxu1 }
 0x207   :  { %245 = vst [vmem:[#allocation8] sm:$0xff] %v242_v43 }
 0x208   :  { %454 = shalt.err (!%p451_p0)
}
 0x209   :  { %s455_s11 = scalar_lea.hbm %s575_s5, 128 }
 0x20a   :  { %p456_p1 = scmp.ne.s32.totalorder %s575_s5, %s455_s11  ;;  %p459_p2 = scmp.lt.u32.totalorder %s455_s11, %s575_s5 }
 0x20c   :  { %p461_p3 = pnand %p459_p2, %p456_p1 }
 0x20e   :  { %464 = shalt.err (!%p461_p3)
}
 0x20f   :  { %255 = dma.vmem_to_hbm [thread:$0]  %s253_s8, 128, %s575_s5, [#allocation4]  }
 0x210   :  { %469 = dma.done.wait [#allocation4], 128  }
 0x211   :  { %470 = vsyncadd [#allocation4], 4294967168 }
 0x212   :  { %259 = vsyncpa [#allocation3], 1 }
 0x213   :  { %260 = vsyncpa [#allocation6], 1 }
 0x214   :  { %261 = vsyncpa [#allocation4], 1 }

</bundles_post_ra>
